<compile_context>
chip_gen: v6e
topology: v6e:2x2x1
jax: 0.10.0
libtpu: 0.0.40
codegen_flags: <defaults>
</compile_context>

<pallas_src>
import math

import jax
import jax.numpy as jnp
from jax.experimental import pallas as pl
from jax.experimental.pallas import tpu as pltpu


def _round_up(v, m):
    return (v + m - 1) // m * m


# ----------------------------- Pallas kernel -------------------------------

def moe_expert_kernel(flags_ref,                      # SMEM (token_tiles, N) int32
                      x_ref, w1_ref, b1_ref, w2_ref, b2_ref, gw_ref,
                      o_ref, acc_ref):
    i = pl.program_id(0)        # token tile
    n = pl.program_id(1)        # expert
    n_last = pl.num_programs(1) - 1

    @pl.when(n == 0)
    def _init():
        acc_ref[...] = jnp.zeros_like(acc_ref)

    # Skip experts whose gating weight is zero for every token in this tile.
    @pl.when(flags_ref[i, n] != 0)
    def _compute():
        x = x_ref[...]                                              # (tm, Dp) f32
        # hidden = relu(x @ W1[n] + b1[n])
        hid = jnp.dot(x, w1_ref[...],
                      preferred_element_type=jnp.float32)           # (tm, Hp)
        hid = jnp.maximum(hid + b1_ref[...], 0.0)
        # expert output = hidden @ W2[n] + b2[n]
        y = jnp.dot(hid, w2_ref[...],
                    preferred_element_type=jnp.float32)             # (tm, Dp)
        y = y + b2_ref[...]
        # weighted accumulate with the gating-weight column (tm, 1)
        acc_ref[...] += gw_ref[...] * y

    @pl.when(n == n_last)
    def _finalize():
        o_ref[...] = acc_ref[...].astype(o_ref.dtype)


def moe_experts_combine(x_flat, gw_flat, W1, b1, W2, b2, *, tm_max=128):
    """Weighted sum over experts of per-expert 2-layer FFN, in one kernel.

    x_flat : (T, D)   flattened tokens (float32)
    gw_flat: (T, N)   gating weights (float32, exactly 0 for non-top-k experts)
    W1     : (N, D, H), b1: (N, H)
    W2     : (N, H, D), b2: (N, D)
    returns: (T, D) float32
    """
    T, D = x_flat.shape
    N, _, H = W1.shape
    out_dtype = x_flat.dtype

    # Lane-dense / MXU-friendly padded sizes.
    Dp = _round_up(D, 128)
    Hp = _round_up(H, 128)
    tm = min(tm_max, _round_up(T, 8))            # token tile (multiple of 8 for f32)
    Tp = _round_up(T, tm)
    num_tiles = Tp // tm

    # Zero-padding is exact: padded x/W rows & cols are 0, padded biases are 0,
    # so padded hidden/output columns are 0 and padded tokens contribute 0.
    x_p = jnp.zeros((Tp, Dp), jnp.float32).at[:T, :D].set(x_flat)
    W1_p = jnp.zeros((N, Dp, Hp), jnp.float32).at[:, :D, :H].set(W1)
    W2_p = jnp.zeros((N, Hp, Dp), jnp.float32).at[:, :H, :D].set(W2)
    b1_p = jnp.zeros((N, 1, Hp), jnp.float32).at[:, 0, :H].set(b1)
    b2_p = jnp.zeros((N, 1, Dp), jnp.float32).at[:, 0, :D].set(b2)

    gw_pad = jnp.zeros((Tp, N), jnp.float32).at[:T].set(gw_flat)
    gw_t = jnp.transpose(gw_pad)[:, :, None]                      # (N, Tp, 1)
    # Per-(token tile, expert) activity flag for dead-expert skipping.
    flags = (gw_pad.reshape(num_tiles, tm, N).max(axis=1) > 0.0).astype(jnp.int32)

    flops = 4 * Tp * N * Dp * Hp                                   # two matmuls
    bytes_accessed = (x_p.size + W1_p.size + W2_p.size + b1_p.size + b2_p.size
                      + gw_t.size + Tp * Dp) * 4

    out = pl.pallas_call(
        moe_expert_kernel,
        out_shape=jax.ShapeDtypeStruct((Tp, Dp), out_dtype),
        grid_spec=pltpu.PrefetchScalarGridSpec(
            num_scalar_prefetch=1,
            grid=(num_tiles, N),
            in_specs=[
                pl.BlockSpec((tm, Dp), lambda i, n, flags: (i, 0)),           # x tile
                pl.BlockSpec((None, Dp, Hp), lambda i, n, flags: (n, 0, 0)),  # W1[n]
                pl.BlockSpec((None, 1, Hp), lambda i, n, flags: (n, 0, 0)),   # b1[n]
                pl.BlockSpec((None, Hp, Dp), lambda i, n, flags: (n, 0, 0)),  # W2[n]
                pl.BlockSpec((None, 1, Dp), lambda i, n, flags: (n, 0, 0)),   # b2[n]
                pl.BlockSpec((None, tm, 1), lambda i, n, flags: (n, i, 0)),   # gating col
            ],
            out_specs=pl.BlockSpec((tm, Dp), lambda i, n, flags: (i, 0)),
            scratch_shapes=[pltpu.VMEM((tm, Dp), jnp.float32)],
        ),
        compiler_params=pltpu.CompilerParams(
            dimension_semantics=("parallel", "arbitrary"),
            vmem_limit_bytes=64 * 1024 * 1024),
        cost_estimate=pl.CostEstimate(flops=flops, transcendentals=0,
                                      bytes_accessed=bytes_accessed),
    )(flags, x_p, W1_p, b1_p, W2_p, b2_p, gw_t)

    return out[:T, :D]


# ----------------------------- JAX glue (gating) ---------------------------

def gating_network(x, Wg, Wnoise, top_k, noise_key, utilization_factor=0.01):
    """Noisy top-k gating, matching GatingNetwork.forward semantics."""
    N = Wg.shape[0]
    noise = jax.nn.softplus(x @ Wnoise.T)
    noise = noise * jax.random.normal(noise_key, noise.shape, dtype=noise.dtype)
    logits = x @ Wg.T + noise                                    # (B, C, N)

    _, idx = jax.lax.top_k(logits, top_k)                        # (B, C, K)
    in_topk = jnp.sum(jax.nn.one_hot(idx, N, dtype=jnp.float32),
                      axis=-2) > 0                               # (B, C, N)
    mask = jnp.where(in_topk, logits, -jnp.inf)
    weights = jax.nn.softmax(mask, axis=-1)                      # exact 0 for non-top-k

    importance = weights.reshape(-1, N).sum(axis=0)
    # torch .var(correction=0) == population variance == jnp.var default (ddof=0)
    square_cv = jnp.var(importance) / (jnp.mean(importance) ** 2)
    return weights, utilization_factor * square_cv


def moe_forward(x, Wg, Wnoise, W1, b1, W2, b2, top_k, noise_key):
    B, C, D = x.shape
    N = W1.shape[0]
    weights, loss = gating_network(x, Wg, Wnoise, top_k, noise_key)
    x_flat = x.reshape(B * C, D)
    gw_flat = weights.reshape(B * C, N)
    out = moe_experts_combine(x_flat, gw_flat, W1, b1, W2, b2)
    return out.reshape(B, C, D), loss, weights


moe_forward_jit = jax.jit(moe_forward, static_argnums=(7,))


# ----------------------------- reference (pure JAX, f32) --------------------

def moe_reference(x, weights, W1, b1, W2, b2):
    a = jnp.einsum('bcd,ndh->bcnh', x, W1,
                   preferred_element_type=jnp.float32) + b1
    z = jax.nn.relu(a)
    y = jnp.einsum('bcnh,nhd->bcnd', z, W2,
                   preferred_element_type=jnp.float32) + b2
    return jnp.einsum('bcn,bcnd->bcd', weights, y)


# ----------------------------- main -----------------------------------------

if __name__ == "__main__":
    # batch, seq, dim_in, dim_hidden, experts, top_k
    B, C, D, H, N, K = 2, 40, 48, 96, 4, 2

    key = jax.random.PRNGKey(0)
    keys = jax.random.split(key, 8)
    std = 1.0 / math.sqrt(D)

    # Experts params (uniform(-std, std), as in Experts.__init__)
    W1 = jax.random.uniform(keys[0], (N, D, H), minval=-std, maxval=std, dtype=jnp.float32)
    b1 = jax.random.uniform(keys[1], (N, H), minval=-std, maxval=std, dtype=jnp.float32)
    W2 = jax.random.uniform(keys[2], (N, H, D), minval=-std, maxval=std, dtype=jnp.float32)
    b2 = jax.random.uniform(keys[3], (N, D), minval=-std, maxval=std, dtype=jnp.float32)
    # Gating linear layers (nn.Linear default init: uniform(-1/sqrt(fan_in), +))
    Wg = jax.random.uniform(keys[4], (N, D), minval=-std, maxval=std, dtype=jnp.float32)
    Wnoise = jax.random.uniform(keys[5], (N, D), minval=-std, maxval=std, dtype=jnp.float32)

    x = jax.random.normal(keys[6], (B, C, D), dtype=jnp.float32)
    noise_key = keys[7]

    out, loss, weights = moe_forward_jit(x, Wg, Wnoise, W1, b1, W2, b2, K, noise_key)
    out = jax.block_until_ready(out)
    loss = jax.block_until_ready(loss)

    # Pure f32 reference with the exact same gating weights.
    ref = moe_reference(x, weights, W1, b1, W2, b2)
    ref = jax.block_until_ready(ref)

    assert out.shape == (B, C, D)
    assert bool(jnp.all(jnp.isfinite(out))), "non-finite kernel output"
    assert bool(jnp.allclose(out, ref, atol=1e-4, rtol=1e-4)), "mismatch vs f32 reference"
    assert bool(jnp.isfinite(loss)), "non-finite utilization loss"

    print("KERNEL_OK")
</pallas_src>

<mosaic_0001>
module attributes {stable_mosaic.version = 11 : i64} {
  func.func @moe_expert_kernel(%arg0: i32, %arg1: i32, %arg2: memref<1x4xi32, #tpu.memory_space<smem>>, %arg3: memref<80x128xf32, #tpu.memory_space<vmem>>, %arg4: memref<1x128x128xf32, #tpu.memory_space<vmem>>, %arg5: memref<1x1x128xf32, #tpu.memory_space<vmem>>, %arg6: memref<1x128x128xf32, #tpu.memory_space<vmem>>, %arg7: memref<1x1x128xf32, #tpu.memory_space<vmem>>, %arg8: memref<1x80x1xf32, #tpu.memory_space<vmem>>, %arg9: memref<80x128xf32, #tpu.memory_space<vmem>>, %arg10: memref<80x128xf32, #tpu.memory_space<vmem>>) attributes {dimension_semantics = [#tpu.dimension_semantics<parallel>, #tpu.dimension_semantics<arbitrary>], iteration_bounds = array<i64: 1, 4>, scalar_prefetch = 1 : i64, scratch_operands = 1 : i64, tpu.core_type = #tpu.core_type<tc>, window_params = [{transform_indices = @transform_0, window_bounds = array<i64: 80, 128>}, {transform_indices = @transform_1, window_bounds = array<i64: 1, 128, 128>}, {transform_indices = @transform_2, window_bounds = array<i64: 1, 1, 128>}, {transform_indices = @transform_3, window_bounds = array<i64: 1, 128, 128>}, {transform_indices = @transform_4, window_bounds = array<i64: 1, 1, 128>}, {transform_indices = @transform_5, window_bounds = array<i64: 1, 80, 1>}, {transform_indices = @transform_6, window_bounds = array<i64: 80, 128>}]} {
    %c0_i32 = arith.constant 0 : i32
    %0 = arith.cmpi eq, %arg1, %c0_i32 : i32
    %1 = arith.extui %0 : i1 to i32
    %c0_i32_0 = arith.constant 0 : i32
    %2 = arith.cmpi ne, %1, %c0_i32_0 : i32
    scf.if %2 {
      %cst = arith.constant 0.000000e+00 : f32
      %12 = vector.broadcast %cst : f32 to vector<80x128xf32>
      %c0 = arith.constant 0 : index
      %c0_4 = arith.constant 0 : index
      %13 = vector.load %arg10[%c0, %c0_4] : memref<80x128xf32, #tpu.memory_space<vmem>>, vector<80x128xf32>
      tpu.vector_store %arg10[%c0, %c0_4], %12 {strides = array<i32>} : memref<80x128xf32, #tpu.memory_space<vmem>>, vector<80x128xf32>,
    } else {
    }
    %3 = arith.index_cast %arg0 : i32 to index
    %4 = arith.index_cast %arg1 : i32 to index
    %5 = memref.load %arg2[%3, %4] : memref<1x4xi32, #tpu.memory_space<smem>>
    %c0_i32_1 = arith.constant 0 : i32
    %6 = arith.cmpi ne, %5, %c0_i32_1 : i32
    %7 = arith.extui %6 : i1 to i32
    %c0_i32_2 = arith.constant 0 : i32
    %8 = arith.cmpi ne, %7, %c0_i32_2 : i32
    scf.if %8 {
      %c0 = arith.constant 0 : index
      %c0_4 = arith.constant 0 : index
      %12 = vector.load %arg3[%c0, %c0_4] : memref<80x128xf32, #tpu.memory_space<vmem>>, vector<80x128xf32>
      %c0_5 = arith.constant 0 : index
      %c0_6 = arith.constant 0 : index
      %c0_7 = arith.constant 0 : index
      %13 = vector.load %arg4[%c0_5, %c0_6, %c0_7] : memref<1x128x128xf32, #tpu.memory_space<vmem>>, vector<1x128x128xf32>
      %14 = vector.shape_cast %13 : vector<1x128x128xf32> to vector<128x128xf32>
      %cst = arith.constant dense<0.000000e+00> : vector<80x128xf32>
      %15 = tpu.matmul %12, %14, %cst {dimension_numbers = #tpu.dot_dimension_numbers<[1], [0], [0], [1], [0, 0, 1, 1], [], []>} : vector<80x128xf32>, vector<128x128xf32>, vector<80x128xf32> -> vector<80x128xf32>
      %c0_8 = arith.constant 0 : index
      %c0_9 = arith.constant 0 : index
      %c0_10 = arith.constant 0 : index
      %16 = vector.load %arg5[%c0_8, %c0_9, %c0_10] : memref<1x1x128xf32, #tpu.memory_space<vmem>>, vector<1x1x128xf32>
      %17 = vector.shape_cast %16 : vector<1x1x128xf32> to vector<1x128xf32>
      %18 = vector.broadcast %17 : vector<1x128xf32> to vector<80x128xf32>
      %19 = arith.addf %15, %18 : vector<80x128xf32>
      %cst_11 = arith.constant 0.000000e+00 : f32
      %20 = vector.broadcast %cst_11 : f32 to vector<80x128xf32>
      %21 = arith.maximumf %19, %20 : vector<80x128xf32>
      %c0_12 = arith.constant 0 : index
      %c0_13 = arith.constant 0 : index
      %c0_14 = arith.constant 0 : index
      %22 = vector.load %arg6[%c0_12, %c0_13, %c0_14] : memref<1x128x128xf32, #tpu.memory_space<vmem>>, vector<1x128x128xf32>
      %23 = vector.shape_cast %22 : vector<1x128x128xf32> to vector<128x128xf32>
      %cst_15 = arith.constant dense<0.000000e+00> : vector<80x128xf32>
      %24 = tpu.matmul %21, %23, %cst_15 {dimension_numbers = #tpu.dot_dimension_numbers<[1], [0], [0], [1], [0, 0, 1, 1], [], []>} : vector<80x128xf32>, vector<128x128xf32>, vector<80x128xf32> -> vector<80x128xf32>
      %c0_16 = arith.constant 0 : index
      %c0_17 = arith.constant 0 : index
      %c0_18 = arith.constant 0 : index
      %25 = vector.load %arg7[%c0_16, %c0_17, %c0_18] : memref<1x1x128xf32, #tpu.memory_space<vmem>>, vector<1x1x128xf32>
      %26 = vector.shape_cast %25 : vector<1x1x128xf32> to vector<1x128xf32>
      %27 = vector.broadcast %26 : vector<1x128xf32> to vector<80x128xf32>
      %28 = arith.addf %24, %27 : vector<80x128xf32>
      %c0_19 = arith.constant 0 : index
      %c0_20 = arith.constant 0 : index
      %29 = vector.load %arg10[%c0_19, %c0_20] : memref<80x128xf32, #tpu.memory_space<vmem>>, vector<80x128xf32>
      %c0_21 = arith.constant 0 : index
      %c0_22 = arith.constant 0 : index
      %c0_23 = arith.constant 0 : index
      %30 = vector.load %arg8[%c0_21, %c0_22, %c0_23] : memref<1x80x1xf32, #tpu.memory_space<vmem>>, vector<1x80x1xf32>
      %31 = vector.shape_cast %30 : vector<1x80x1xf32> to vector<80x1xf32>
      %32 = vector.broadcast %31 : vector<80x1xf32> to vector<80x128xf32>
      %33 = arith.mulf %32, %28 : vector<80x128xf32>
      %34 = arith.addf %29, %33 : vector<80x128xf32>
      %c0_24 = arith.constant 0 : index
      %c0_25 = arith.constant 0 : index
      %35 = vector.load %arg10[%c0_24, %c0_25] : memref<80x128xf32, #tpu.memory_space<vmem>>, vector<80x128xf32>
      tpu.vector_store %arg10[%c0_24, %c0_25], %34 {strides = array<i32>} : memref<80x128xf32, #tpu.memory_space<vmem>>, vector<80x128xf32>,
    } else {
    }
    %c3_i32 = arith.constant 3 : i32
    %9 = arith.cmpi eq, %arg1, %c3_i32 : i32
    %10 = arith.extui %9 : i1 to i32
    %c0_i32_3 = arith.constant 0 : i32
    %11 = arith.cmpi ne, %10, %c0_i32_3 : i32
    scf.if %11 {
      %c0 = arith.constant 0 : index
      %c0_4 = arith.constant 0 : index
      %12 = vector.load %arg10[%c0, %c0_4] : memref<80x128xf32, #tpu.memory_space<vmem>>, vector<80x128xf32>
      %c0_5 = arith.constant 0 : index
      %c0_6 = arith.constant 0 : index
      %13 = vector.load %arg9[%c0_5, %c0_6] : memref<80x128xf32, #tpu.memory_space<vmem>>, vector<80x128xf32>
      tpu.vector_store %arg9[%c0_5, %c0_6], %12 {strides = array<i32>} : memref<80x128xf32, #tpu.memory_space<vmem>>, vector<80x128xf32>,
    } else {
    }
    return
  }
  func.func @transform_0(%arg0: i32, %arg1: i32, %arg2: memref<1x4xi32, #tpu.memory_space<smem>>) -> (i32, i32) {
    %c0_i32 = arith.constant 0 : i32
    %c0_i32_0 = arith.constant 0 : i32
    return %arg0, %c0_i32 : i32, i32
  }
  func.func @transform_1(%arg0: i32, %arg1: i32, %arg2: memref<1x4xi32, #tpu.memory_space<smem>>) -> (i32, i32, i32) {
    %c0_i32 = arith.constant 0 : i32
    %c0_i32_0 = arith.constant 0 : i32
    %c0_i32_1 = arith.constant 0 : i32
    return %arg1, %c0_i32, %c0_i32_0 : i32, i32, i32
  }
  func.func @transform_2(%arg0: i32, %arg1: i32, %arg2: memref<1x4xi32, #tpu.memory_space<smem>>) -> (i32, i32, i32) {
    %c0_i32 = arith.constant 0 : i32
    %c0_i32_0 = arith.constant 0 : i32
    %c0_i32_1 = arith.constant 0 : i32
    return %arg1, %c0_i32, %c0_i32_0 : i32, i32, i32
  }
  func.func @transform_3(%arg0: i32, %arg1: i32, %arg2: memref<1x4xi32, #tpu.memory_space<smem>>) -> (i32, i32, i32) {
    %c0_i32 = arith.constant 0 : i32
    %c0_i32_0 = arith.constant 0 : i32
    %c0_i32_1 = arith.constant 0 : i32
    return %arg1, %c0_i32, %c0_i32_0 : i32, i32, i32
  }
  func.func @transform_4(%arg0: i32, %arg1: i32, %arg2: memref<1x4xi32, #tpu.memory_space<smem>>) -> (i32, i32, i32) {
    %c0_i32 = arith.constant 0 : i32
    %c0_i32_0 = arith.constant 0 : i32
    %c0_i32_1 = arith.constant 0 : i32
    return %arg1, %c0_i32, %c0_i32_0 : i32, i32, i32
  }
  func.func @transform_5(%arg0: i32, %arg1: i32, %arg2: memref<1x4xi32, #tpu.memory_space<smem>>) -> (i32, i32, i32) {
    %c0_i32 = arith.constant 0 : i32
    %c0_i32_0 = arith.constant 0 : i32
    return %arg1, %arg0, %c0_i32 : i32, i32, i32
  }
  func.func @transform_6(%arg0: i32, %arg1: i32, %arg2: memref<1x4xi32, #tpu.memory_space<smem>>) -> (i32, i32) {
    %c0_i32 = arith.constant 0 : i32
    %c0_i32_0 = arith.constant 0 : i32
    return %arg0, %c0_i32 : i32, i32
  }
}

</mosaic_0001>

<bundles_post_ra>
// kernel: moe_forward.1
= control target key start
LH: loop header
LB: loop body
LE: loop exit
PB: predicated region body
PF: predicated region fallthrough
CT: control target
= control target key end

     0   :  { %s1424_s0 = inlined_call_operand.vmem [shape: s32[1,4], index: 0, kind: input, shape index: {}]   ;;  %s1425_s1 = inlined_call_operand.vmem [shape: f32[80,128], index: 1, kind: input, shape index: {}]   ;;  %s1426_s2 = inlined_call_operand.vmem [shape: f32[4,128,128], index: 2, kind: input, shape index: {}]   ;;  %s1427_s3 = inlined_call_operand.vmem [shape: f32[4,1,128], index: 3, kind: input, shape index: {}]   ;;  %s1428_s4 = inlined_call_operand.vmem [shape: f32[4,128,128], index: 4, kind: input, shape index: {}]   ;;  %s1429_s5 = inlined_call_operand.vmem [shape: f32[4,1,128], index: 5, kind: input, shape index: {}]   ;;  %s1430_s6 = inlined_call_operand.vmem [shape: f32[4,80,1], index: 6, kind: input, shape index: {}]   ;;  %s1431_s7 = inlined_call_operand.hbm [shape: f32[80,128], index: 7, kind: output, shape index: {}]  }
   0x1   :  { %s12_s26 = sshll.u32 %s1424_s0, 4  ;;  %s13_s26 = int_to_ptr.vmem [resolvable:$true] %s12_s26 }
   0x2   :  { %s1147_s27 = scalar_lea.vmem %s13_s26, 16  ;;  %p1152_p1 = scmp.lt.s32.totalorder %s13_s26, %s13_s26 }
   0x3   :  { %p1148_p0 = scmp.ne.s32.totalorder %s13_s26, %s1147_s27  ;;  %p1153_p2 = scmp.lt.s32.totalorder %s1147_s27, %s1147_s27 }
   0x5   :  { %p1154_p3 = por %p1153_p2, %p1152_p1 }
   0x7   :  { %p1155_p4 = pnand %p1154_p3, %p1148_p0 }
   0x9   :  { %1158 = shalt.err (!%p1155_p4)  }
   0xa   :  { %s1213_s28 = smov [#allocation4]  }
   0xb   :  { %15 = dma.vmem_to_smem %s13_s26, 16, %s1213_s28, [#allocation3] }
   0xc   :  { %1195 = dma.done.wait [#allocation3], 16 }
   0xd   :  { %1196 = vsyncadd [#allocation3], 4294967280 }
   0xe   :  { %17 = sfence }
   0xf   :  { %18 = vsyncpa [#allocation6], 0  ;;  %s1262_s29 = smov 0   ;;  %s1264_s30 = smov 0  }
  0x10   :  { %s1266_s8 = smov 0  }
  0x11 LB: > { %s940_s0 = sadd.s32 4294967295, %s1211_s8   ;;  %s33_s9 = sadd.s32 1, %s1207_s30  ;;  %s1211_s8 = sphi %s1266_s8, %s24_s8   ;;  %s1207_s30 = sphi %s1264_s30, %s1434_s30   ;;  %s1203_s29 = sphi %s1262_s29, %s1433_s29  }
  0x12   : > { %p34_p5 = scmp.ge.s32.totalorder %s33_s9, 4  ;;  %p944_p6 = scmp.ge.s32.totalorder %s1211_s8, 1 }
  0x13   : > { %p286_p7 = scmp.lt.s32.totalorder %s1211_s8, 5 }
  0x14   : > { %s1436_s9 = smov (%p34_p5, %s33_s9), 0 }
  0x15   : > { %p287_p8 = pnand %p944_p6, %p286_p7 }
  0x16   : > { %p342_p9 = scmp.lt.s32.totalorder (!%p287_p8), %s1203_s29, 3  ;;  %p950_p10 = scmp.ne.s32.totalorder (!%p287_p8), %s1203_s29, 0 }
  0x17   : > { %290 = sbr.rel (%p287_p8) target bundleno = 540 (0x21c), region = 44 }
  0x1c   : > { %s1285_s10 = scalar_select %p342_p9, %s1203_s29, 3 }
  0x1e   : > { %s960_s11 = sshll.u32 %s1285_s10, 7  ;;  %s349_s14 = scalar_lea.vmem %s1427_s3, %s1285_s10 }
  0x1f   : > { %s1295_s17 = scalar_lea.vmem %s1426_s2, %s960_s11  ;;  %s1300_s20 = scalar_lea.vmem %s1428_s4, %s960_s11 }
  0x20   : > { %s357_s23 = scalar_lea.vmem %s1429_s5, %s1285_s10  ;;  %s1108_s24 = smul.u32 80, %s1285_s10 }
  0x21   : > { %372 = sbr.rel (%p950_p10) target bundleno = 44 (0x2c), region = 48 }
  0x22   : > { %s1310_s27 = scalar_lea.vmem %s1430_s6, %s1108_s24 }
  0x26   : > { %v1214_v0 = vmov 0.0  }
  0x27   : > { %373 = vst [vmem:[#allocation2 + $0x30] sm:$0xff] %v1214_v0  ;;  %374 = vst [vmem:[#allocation2] sm:$0xff] %v1214_v0 }
  0x28   : > { %375 = vst [vmem:[#allocation2 + $0x18] sm:$0xff] %v1214_v0  ;;  %376 = vst [vmem:[#allocation2 + $0x10] sm:$0xff] %v1214_v0 }
  0x29   : > { %377 = vst [vmem:[#allocation2 + $0x48] sm:$0xff] %v1214_v0  ;;  %378 = vst [vmem:[#allocation2 + $0x28] sm:$0xff] %v1214_v0 }
  0x2a   : > { %379 = vst [vmem:[#allocation2 + $0x8] sm:$0xff] %v1214_v0  ;;  %380 = vst [vmem:[#allocation2 + $0x20] sm:$0xff] %v1214_v0 }
  0x2b   : > { %381 = vst [vmem:[#allocation2 + $0x40] sm:$0xff] %v1214_v0  ;;  %382 = vst [vmem:[#allocation2 + $0x38] sm:$0xff] %v1214_v0 }
  0x2c PF: > { %s383_s28 = sshra.s32 %s1203_s29, 7  ;;  %s388_s11 = sand.u32 127, %s1203_s29 }
  0x2d   : > { %s951_s12 = sshll.u32 %s383_s28, 7 }
  0x2e   : > { %s389_s13 = sadd.s32 %s951_s12, %s388_s11 }
  0x2f   : > { %s390_s15 = sld [smem:[#allocation4 + %s389_s13]] }
  0x35   : > { %p952_p11 = scmp.eq.s32.totalorder %s390_s15, 0 }
  0x37   : > { %394 = sbr.rel (%p952_p11) target bundleno = 511 (0x1ff), region = 52 }
  0x3c   : > { %v420_v1 = vld [vmem:[%s1295_s17 + $0x78] sm:$0xff]  ;;  %v419_v2 = vld [vmem:[%s1295_s17 + $0x70] sm:$0xff]  ;;  %v418_v3 = vld [vmem:[%s1295_s17 + $0x68] sm:$0xff]  ;;  %v1215_v45 = vmov 0  }
  0x3d   : > { %1014 = vmatprep.subr.mxu0 %v420_v1  ;;  %v417_v4 = vld [vmem:[%s1295_s17 + $0x60] sm:$0xff]  ;;  %v416_v6 = vld [vmem:[%s1295_s17 + $0x58] sm:$0xff]  ;;  %v415_v7 = vld [vmem:[%s1295_s17 + $0x50] sm:$0xff]  ;;  %1146 = vset.pattern.permute.xlu1 %v1215_v45 }
  0x3e   : > { %1015 = vmatpush3.msra.mxu0 %v420_v1  ;;  %v395_v5 = vld [vmem:[%s1425_s1] sm:$0xff]  ;;  %v568_v8 = vld [vmem:[%s1300_s20 + $0x78] sm:$0xff]  ;;  %v567_v9 = vld [vmem:[%s1300_s20 + $0x70] sm:$0xff]  ;;  %1145 = vset.pattern.permute.xlu0 %v1215_v45 }
  0x3f   : > { %1016 = vmatprep.subr.mxu0 %v419_v2  ;;  %1046 = vmatprep.mubr.f32.mxu0 %v395_v5  ;;  %v414_v10 = vld [vmem:[%s1295_s17 + $0x48] sm:$0xff]  ;;  %v413_v12 = vld [vmem:[%s1295_s17 + $0x40] sm:$0xff]  ;;  %v412_v14 = vld [vmem:[%s1295_s17 + $0x38] sm:$0xff] }
  0x40   : > { %1017 = vmatpush3.msra.mxu0 %v419_v2  ;;  %1061 = vmatprep.subr.mxu1 %v568_v8  ;;  %v566_v11 = vld [vmem:[%s1300_s20 + $0x68] sm:$0xff]  ;;  %v565_v13 = vld [vmem:[%s1300_s20 + $0x60] sm:$0xff]  ;;  %v564_v15 = vld [vmem:[%s1300_s20 + $0x58] sm:$0xff] }
  0x41   : > { %1018 = vmatprep.subr.mxu0 %v418_v3  ;;  %1062 = vmatpush3.msra.mxu1 %v568_v8  ;;  %v411_v16 = vld [vmem:[%s1295_s17 + $0x30] sm:$0xff]  ;;  %v410_v18 = vld [vmem:[%s1295_s17 + $0x28] sm:$0xff]  ;;  %v409_v20 = vld [vmem:[%s1295_s17 + $0x20] sm:$0xff] }
  0x42   : > { %1019 = vmatpush3.msra.mxu0 %v418_v3  ;;  %1063 = vmatprep.subr.mxu1 %v567_v9  ;;  %v563_v17 = vld [vmem:[%s1300_s20 + $0x50] sm:$0xff]  ;;  %v562_v19 = vld [vmem:[%s1300_s20 + $0x48] sm:$0xff]  ;;  %v561_v21 = vld [vmem:[%s1300_s20 + $0x40] sm:$0xff] }
  0x43   : > { %1020 = vmatprep.subr.mxu0 %v417_v4  ;;  %1064 = vmatpush3.msra.mxu1 %v567_v9  ;;  %v408_v22 = vld [vmem:[%s1295_s17 + $0x18] sm:$0xff]  ;;  %v407_v24 = vld [vmem:[%s1295_s17 + $0x10] sm:$0xff]  ;;  %v406_v26 = vld [vmem:[%s1295_s17 + $0x8] sm:$0xff] }
  0x44   : > { %1021 = vmatpush3.msra.mxu0 %v417_v4  ;;  %1065 = vmatprep.subr.mxu1 %v566_v11  ;;  %v560_v23 = vld [vmem:[%s1300_s20 + $0x38] sm:$0xff]  ;;  %v559_v25 = vld [vmem:[%s1300_s20 + $0x30] sm:$0xff]  ;;  %v558_v27 = vld [vmem:[%s1300_s20 + $0x28] sm:$0xff] }
  0x45   : > { %1022 = vmatprep.subr.mxu0 %v416_v6  ;;  %1066 = vmatpush3.msra.mxu1 %v566_v11  ;;  %v405_v28 = vld [vmem:[%s1295_s17] sm:$0xff]  ;;  %v396_v30 = vld [vmem:[%s1425_s1 + $0x8] sm:$0xff]  ;;  %v397_v31 = vld [vmem:[%s1425_s1 + $0x10] sm:$0xff] }
  0x46   : > { %1023 = vmatpush3.msra.mxu0 %v416_v6  ;;  %1067 = vmatprep.subr.mxu1 %v565_v13  ;;  %v557_v29 = vld [vmem:[%s1300_s20 + $0x20] sm:$0xff]  ;;  %v398_v32 = vld [vmem:[%s1425_s1 + $0x18] sm:$0xff]  ;;  %v400_v34 = vld [vmem:[%s1425_s1 + $0x28] sm:$0xff] }
  0x47   : > { %1024 = vmatprep.subr.mxu0 %v415_v7  ;;  %1068 = vmatpush3.msra.mxu1 %v565_v13  ;;  %v399_v33 = vld [vmem:[%s1425_s1 + $0x20] sm:$0xff]  ;;  %v401_v35 = vld [vmem:[%s1425_s1 + $0x30] sm:$0xff]  ;;  %v402_v36 = vld [vmem:[%s1425_s1 + $0x38] sm:$0xff] }
  0x48   : > { %1025 = vmatpush3.msra.mxu0 %v415_v7  ;;  %1069 = vmatprep.subr.mxu1 %v564_v15  ;;  %v403_v37 = vld [vmem:[%s1425_s1 + $0x40] sm:$0xff]  ;;  %v404_v38 = vld [vmem:[%s1425_s1 + $0x48] sm:$0xff]  ;;  %v556_v39 = vld [vmem:[%s1300_s20 + $0x18] sm:$0xff] }
  0x49   : > { %1026 = vmatprep.subr.mxu0 %v414_v10  ;;  %1070 = vmatpush3.msra.mxu1 %v564_v15  ;;  %v555_v40 = vld [vmem:[%s1300_s20 + $0x10] sm:$0xff]  ;;  %v554_v41 = vld [vmem:[%s1300_s20 + $0x8] sm:$0xff]  ;;  %v553_v42 = vld [vmem:[%s1300_s20] sm:$0xff] }
  0x4a   : > { %1027 = vmatpush3.msra.mxu0 %v414_v10  ;;  %1071 = vmatprep.subr.mxu1 %v563_v17  ;;  %v703_v43 = vld [vmem:[%s1310_s27 + $0x10] sm:$0xff]  ;;  %v701_v44 = vld [vmem:[%s1310_s27] sm:$0xff]  ;;  %v704_v46 = vld [vmem:[%s1310_s27 + $0x18] sm:$0xff] }
  0x4b   : > { %1028 = vmatprep.subr.mxu0 %v413_v12  ;;  %1072 = vmatpush3.msra.mxu1 %v563_v17  ;;  %v702_v47 = vld [vmem:[%s1310_s27 + $0x8] sm:$0xff]  ;;  %v705_v49 = vld [vmem:[%s1310_s27 + $0x20] sm:$0xff]  ;;  %v708_v50 = vld [vmem:[%s1310_s27 + $0x38] sm:$0xff] }
  0x4c   : > { %1029 = vmatpush3.msra.mxu0 %v413_v12  ;;  %1073 = vmatprep.subr.mxu1 %v562_v19  ;;  %v706_v48 = vld [vmem:[%s1310_s27 + $0x28] sm:$0xff]  ;;  %v707_v51 = vld [vmem:[%s1310_s27 + $0x30] sm:$0xff]  ;;  %v709_v53 = vld [vmem:[%s1310_s27 + $0x40] sm:$0xff] }
  0x4d   : > { %1030 = vmatprep.subr.mxu0 %v412_v14  ;;  %1074 = vmatpush3.msra.mxu1 %v562_v19  ;;  %v710_v52 = vld [vmem:[%s1310_s27 + $0x48] sm:$0xff]  ;;  %v953_v54 = vld [vmem:[%s349_s14] ss:$0 sm:$0xff] }
  0x4e   : > { %1031 = vmatpush3.msra.mxu0 %v412_v14  ;;  %1075 = vmatprep.subr.mxu1 %v561_v21 }
  0x4f   : > { %1032 = vmatprep.subr.mxu0 %v411_v16  ;;  %1076 = vmatpush3.msra.mxu1 %v561_v21 }
  0x50   : > { %1033 = vmatpush3.msra.mxu0 %v411_v16  ;;  %1077 = vmatprep.subr.mxu1 %v560_v23 }
  0x51   : > { %1034 = vmatprep.subr.mxu0 %v410_v18  ;;  %1078 = vmatpush3.msra.mxu1 %v560_v23  ;;  %v954_v23 = vld [vmem:[%s357_s23] ss:$0 sm:$0xff] }
  0x52   : > { %1035 = vmatpush3.msra.mxu0 %v410_v18  ;;  %1079 = vmatprep.subr.mxu1 %v559_v25 }
  0x53   : > { %1036 = vmatprep.subr.mxu0 %v409_v20  ;;  %1080 = vmatpush3.msra.mxu1 %v559_v25 }
  0x54   : > { %1037 = vmatpush3.msra.mxu0 %v409_v20  ;;  %1081 = vmatprep.subr.mxu1 %v558_v27 }
  0x55   : > { %1038 = vmatprep.subr.mxu0 %v408_v22  ;;  %1082 = vmatpush3.msra.mxu1 %v558_v27 }
  0x56   : > { %1039 = vmatpush3.msra.mxu0 %v408_v22  ;;  %1083 = vmatprep.subr.mxu1 %v557_v29 }
  0x57   : > { %1040 = vmatprep.subr.mxu0 %v407_v24  ;;  %1084 = vmatpush3.msra.mxu1 %v557_v29 }
  0x58   : > { %1041 = vmatpush3.msra.mxu0 %v407_v24  ;;  %1085 = vmatprep.subr.mxu1 %v556_v39 }
  0x59   : > { %1042 = vmatprep.subr.mxu0 %v406_v26  ;;  %1086 = vmatpush3.msra.mxu1 %v556_v39 }
  0x5a   : > { %1043 = vmatpush3.msra.mxu0 %v406_v26  ;;  %1087 = vmatprep.subr.mxu1 %v555_v40 }
  0x5b   : > { %1044 = vmatprep.subr.mxu0 %v405_v28  ;;  %1088 = vmatpush3.msra.mxu1 %v555_v40 }
  0x5c   : > { %1045 = vmatpush3.msra.mxu0 %v405_v28  ;;  %1089 = vmatprep.subr.mxu1 %v554_v41  ;;  %v692_v28 = vld [vmem:[#allocation2] sm:$0xff] }
  0x5d   : > { %1047 = vmatmul.mubr.f32.vlgmr.msra.gmra.mxu0 %v396_v30  ;;  %1090 = vmatpush3.msra.mxu1 %v554_v41 }
  0x5e   : > { %1049 = vmatprep.mubr.f32.mxu0 %v397_v31  ;;  %1091 = vmatprep.subr.mxu1 %v553_v42 }
  0x5f   : > { %1092 = vmatpush3.msra.mxu1 %v553_v42  ;;  %723 = vperm.xlu1 %1146, %v703_v43  }
  0x60   : > { %713 = vperm.xlu0 %1145, %v701_v44   ;;  %v693_v44 = vld [vmem:[#allocation2 + $0x18] sm:$0xff] }
  0x61   : > { %1050 = vmatmul.mubr.f32.gmra.mxu0 %v398_v32  ;;  %v691_v32 = vld [vmem:[#allocation2 + $0x30] sm:$0xff] }
  0x62   : > { %1052 = vmatprep.mubr.f32.mxu0 %v399_v33 }
  0x63   : > { %728 = vperm.xlu1 %1146, %v704_v46  }
  0x64   : > { %718 = vperm.xlu0 %1145, %v702_v47  }
  0x65   : > { %1053 = vmatmul.mubr.f32.gmra.mxu0 %v400_v34 }
  0x66   : > { %1055 = vmatprep.mubr.f32.mxu0 %v401_v35 }
  0x67   : > { %738 = vperm.xlu1 %1146, %v706_v48  }
  0x68   : > { %733 = vperm.xlu0 %1145, %v705_v49   ;;  %v696_v49 = vld [vmem:[#allocation2 + $0x28] sm:$0xff] }
  0x69   : > { %1056 = vmatmul.mubr.f32.gmra.mxu0 %v402_v36 }
  0x6a   : > { %1058 = vmatprep.mubr.f32.mxu0 %v403_v37 }
  0x6b   : > { %748 = vperm.xlu1 %1146, %v708_v50  }
  0x6c   : > { %743 = vperm.xlu0 %1145, %v707_v51  }
  0x6d   : > { %1059 = vmatmul.mubr.f32.gmra.mxu0 %v404_v38  ;;  %v694_v38 = vld [vmem:[#allocation2 + $0x10] sm:$0xff] }
  0x6f   : > { %758 = vperm.xlu1 %1146, %v710_v52  }
  0x70   : > { %753 = vperm.xlu0 %1145, %v709_v53  }
  0xda   : > { %v724_v21 = vpop.permute.xlu1 %723 }
  0xdb   : > { %v714_v22 = vpop.permute.xlu0 %713 }
  0xde   : > { %v729_v24 = vpop.permute.xlu1 %728 }
  0xdf   : > { %v719_v27 = vpop.permute.xlu0 %718 }
  0xe2   : > { %v739_v37 = vpop.permute.xlu1 %738 }
  0xe3   : > { %v734_v43 = vpop.permute.xlu0 %733 }
 0x11d   : > { %v1048_v55 = vpop.f32.mrf.mxu0 }
 0x11e   : > { %v500_v56 = vadd.f32 %v1048_v55, %v953_v54  ;;  %v695_v55 = vld [vmem:[#allocation2 + $0x48] sm:$0xff] }
 0x11f   : > { %v494_v57 = vpop.f32.mrf.mxu0 }
 0x120   : > { %v495_v58 = vadd.f32 %v953_v54, %v494_v57  ;;  %v544_v61 = vmax.f32 %v500_v56, 0.0 }
 0x121   : > { %v1051_v59 = vpop.f32.mrf.mxu0 }
 0x122   : > { %v543_v60 = vmax.f32 %v495_v58, 0.0  ;;  %v510_v62 = vadd.f32 %v1051_v59, %v953_v54 }
 0x123   : > { %v504_v63 = vpop.f32.mrf.mxu0 }
 0x124   : > { %v505_v0 = vadd.f32 %v953_v54, %v504_v63  ;;  %1093 = vmatprep.mubr.f32.mxu1 %v543_v60  ;;  %v546_v3 = vmax.f32 %v510_v62, 0.0  ;;  %v744_v60 = vpop.permute.xlu0 %743 }
 0x125   : > { %v1054_v1 = vpop.f32.mrf.mxu0  ;;  %1094 = vmatmul.mubr.f32.vlgmr.msra.gmra.mxu1 %v544_v61  ;;  %v698_v61 = vld [vmem:[#allocation2 + $0x20] sm:$0xff] }
 0x126   : > { %v545_v2 = vmax.f32 %v505_v0, 0.0  ;;  %v520_v4 = vadd.f32 %v1054_v1, %v953_v54 }
 0x127   : > { %v514_v5 = vpop.f32.mrf.mxu0 }
 0x128   : > { %v515_v6 = vadd.f32 %v953_v54, %v514_v5  ;;  %1096 = vmatprep.mubr.f32.mxu1 %v545_v2  ;;  %v548_v9 = vmax.f32 %v520_v4, 0.0  ;;  %v697_v2 = vld [vmem:[#allocation2 + $0x8] sm:$0xff] }
 0x129   : > { %v1057_v7 = vpop.f32.mrf.mxu0  ;;  %1097 = vmatmul.mubr.f32.gmra.mxu1 %v546_v3 }
 0x12a   : > { %v547_v8 = vmax.f32 %v515_v6, 0.0  ;;  %v530_v10 = vadd.f32 %v1057_v7, %v953_v54 }
 0x12b   : > { %v524_v11 = vpop.f32.mrf.mxu0 }
 0x12c   : > { %v525_v12 = vadd.f32 %v953_v54, %v524_v11  ;;  %1099 = vmatprep.mubr.f32.mxu1 %v547_v8  ;;  %v550_v15 = vmax.f32 %v530_v10, 0.0  ;;  %v700_v8 = vld [vmem:[#allocation2 + $0x38] sm:$0xff] }
 0x12d   : > { %v1060_v13 = vpop.f32.mrf.mxu0  ;;  %1100 = vmatmul.mubr.f32.gmra.mxu1 %v548_v9 }
 0x12e   : > { %v549_v14 = vmax.f32 %v525_v12, 0.0  ;;  %v540_v16 = vadd.f32 %v1060_v13, %v953_v54  ;;  %v754_v13 = vpop.permute.xlu0 %753 }
 0x12f   : > { %v534_v17 = vpop.f32.mrf.mxu0 }
 0x130   : > { %v535_v18 = vadd.f32 %v953_v54, %v534_v17  ;;  %1102 = vmatprep.mubr.f32.mxu1 %v549_v14  ;;  %v552_v20 = vmax.f32 %v540_v16, 0.0  ;;  %v749_v54 = vpop.permute.xlu1 %748  ;;  %v699_v14 = vld [vmem:[#allocation2 + $0x40] sm:$0xff] }
 0x131   : > { %1103 = vmatmul.mubr.f32.gmra.mxu1 %v550_v15 }
 0x132   : > { %v551_v19 = vmax.f32 %v535_v18, 0.0 }
 0x134   : > { %1105 = vmatprep.mubr.f32.mxu1 %v551_v19  ;;  %v759_v7 = vpop.permute.xlu1 %758 }
 0x135   : > { %1106 = vmatmul.mubr.f32.gmra.mxu1 %v552_v20 }
 0x1e5   : > { %v1095_v25 = vpop.f32.mrf.mxu1 }
 0x1e6   : > { %v648_v26 = vadd.f32 %v1095_v25, %v954_v23 }
 0x1e7   : > { %v642_v29 = vpop.f32.mrf.mxu1 }
 0x1e8   : > { %v762_v30 = vmul.f32 %v719_v27, %v648_v26  ;;  %v643_v31 = vadd.f32 %v954_v23, %v642_v29 }
 0x1e9   : > { %v1098_v33 = vpop.f32.mrf.mxu1 }
 0x1ea   : > { %v772_v34 = vadd.f32 %v762_v30, %v692_v28  ;;  %v761_v35 = vmul.f32 %v714_v22, %v643_v31  ;;  %v658_v36 = vadd.f32 %v1098_v33, %v954_v23 }
 0x1eb   : > { %v652_v39 = vpop.f32.mrf.mxu1 }
 0x1ec   : > { %782 = vst [vmem:[#allocation2] sm:$0xff] %v772_v34  ;;  %v771_v40 = vadd.f32 %v761_v35, %v691_v32  ;;  %v764_v41 = vmul.f32 %v729_v24, %v658_v36  ;;  %v653_v42 = vadd.f32 %v954_v23, %v652_v39 }
 0x1ed   : > { %v1101_v45 = vpop.f32.mrf.mxu1 }
 0x1ee   : > { %781 = vst [vmem:[#allocation2 + $0x30] sm:$0xff] %v771_v40  ;;  %v774_v46 = vadd.f32 %v764_v41, %v694_v38  ;;  %v763_v47 = vmul.f32 %v724_v21, %v653_v42  ;;  %v668_v48 = vadd.f32 %v1101_v45, %v954_v23 }
 0x1ef   : > { %v662_v50 = vpop.f32.mrf.mxu1 }
 0x1f0   : > { %784 = vst [vmem:[#allocation2 + $0x10] sm:$0xff] %v774_v46  ;;  %v773_v51 = vadd.f32 %v763_v47, %v693_v44  ;;  %v766_v52 = vmul.f32 %v739_v37, %v668_v48  ;;  %v663_v53 = vadd.f32 %v954_v23, %v662_v50 }
 0x1f1   : > { %v1104_v56 = vpop.f32.mrf.mxu1 }
 0x1f2   : > { %783 = vst [vmem:[#allocation2 + $0x18] sm:$0xff] %v773_v51  ;;  %v776_v57 = vadd.f32 %v766_v52, %v696_v49  ;;  %v765_v58 = vmul.f32 %v734_v43, %v663_v53  ;;  %v678_v59 = vadd.f32 %v1104_v56, %v954_v23 }
 0x1f3   : > { %v672_v62 = vpop.f32.mrf.mxu1 }
 0x1f4   : > { %786 = vst [vmem:[#allocation2 + $0x28] sm:$0xff] %v776_v57  ;;  %v775_v63 = vadd.f32 %v765_v58, %v695_v55  ;;  %v768_v0 = vmul.f32 %v749_v54, %v678_v59  ;;  %v673_v1 = vadd.f32 %v954_v23, %v672_v62 }
 0x1f5   : > { %v1107_v3 = vpop.f32.mrf.mxu1 }
 0x1f6   : > { %785 = vst [vmem:[#allocation2 + $0x48] sm:$0xff] %v775_v63  ;;  %v778_v4 = vadd.f32 %v768_v0, %v698_v61  ;;  %v767_v5 = vmul.f32 %v744_v60, %v673_v1  ;;  %v688_v6 = vadd.f32 %v1107_v3, %v954_v23 }
 0x1f7   : > { %v682_v9 = vpop.f32.mrf.mxu1 }
 0x1f8   : > { %788 = vst [vmem:[#allocation2 + $0x20] sm:$0xff] %v778_v4  ;;  %v777_v10 = vadd.f32 %v767_v5, %v697_v2  ;;  %v770_v11 = vmul.f32 %v759_v7, %v688_v6  ;;  %v683_v12 = vadd.f32 %v954_v23, %v682_v9 }
 0x1fa   : > { %787 = vst [vmem:[#allocation2 + $0x8] sm:$0xff] %v777_v10  ;;  %v780_v15 = vadd.f32 %v770_v11, %v700_v8  ;;  %v769_v16 = vmul.f32 %v754_v13, %v683_v12 }
 0x1fc   : > { %790 = vst [vmem:[#allocation2 + $0x38] sm:$0xff] %v780_v15  ;;  %v779_v17 = vadd.f32 %v769_v16, %v699_v14 }
 0x1fe   : > { %789 = vst [vmem:[#allocation2 + $0x40] sm:$0xff] %v779_v17 }
 0x1ff PF: > { %p955_p12 = scmp.ne.s32.totalorder %s1203_s29, 3 }
 0x201   : > { %794 = sbr.rel (%p955_p12) target bundleno = 524 (0x20c), region = 56 }
 0x206   : > { %v795_v18 = vld [vmem:[#allocation2 + $0x30] sm:$0xff]  ;;  %v796_v19 = vld [vmem:[#allocation2] sm:$0xff]  ;;  %v797_v20 = vld [vmem:[#allocation2 + $0x18] sm:$0xff] }
 0x207   : > { %805 = vst [vmem:[#allocation5] sm:$0xff] %v795_v18  ;;  %806 = vst [vmem:[#allocation5 + $0x8] sm:$0xff] %v796_v19  ;;  %v798_v21 = vld [vmem:[#allocation2 + $0x10] sm:$0xff]  ;;  %v799_v22 = vld [vmem:[#allocation2 + $0x48] sm:$0xff] }
 0x208   : > { %807 = vst [vmem:[#allocation5 + $0x10] sm:$0xff] %v797_v20  ;;  %v800_v23 = vld [vmem:[#allocation2 + $0x28] sm:$0xff]  ;;  %808 = vst [vmem:[#allocation5 + $0x18] sm:$0xff] %v798_v21  ;;  %v802_v25 = vld [vmem:[#allocation2 + $0x20] sm:$0xff] }
 0x209   : > { %809 = vst [vmem:[#allocation5 + $0x20] sm:$0xff] %v799_v22  ;;  %810 = vst [vmem:[#allocation5 + $0x28] sm:$0xff] %v800_v23  ;;  %v801_v24 = vld [vmem:[#allocation2 + $0x8] sm:$0xff]  ;;  %v803_v26 = vld [vmem:[#allocation2 + $0x40] sm:$0xff] }
 0x20a   : > { %811 = vst [vmem:[#allocation5 + $0x30] sm:$0xff] %v801_v24  ;;  %812 = vst [vmem:[#allocation5 + $0x38] sm:$0xff] %v802_v25  ;;  %v804_v27 = vld [vmem:[#allocation2 + $0x38] sm:$0xff] }
 0x20b   : > { %813 = vst [vmem:[#allocation5 + $0x40] sm:$0xff] %v803_v26  ;;  %814 = vst [vmem:[#allocation5 + $0x48] sm:$0xff] %v804_v27 }
 0x20c PF: > { %p1400_p13 = scmp.eq.s32.totalorder %s940_s0, 3  ;;  %s1216_s10 = smov [#allocation5]  }
 0x20d   : > { %s824_s23 = sshll.u32 %s1216_s10, 4  ;;  %s825_s23 = int_to_ptr.vmem [resolvable:$true] %s824_s23 }
 0x20e   : > { %s1159_s25 = scalar_lea.vmem %s825_s23, 1280  ;;  %p1166_p3 = scmp.lt.s32.totalorder %s825_s23, %s825_s23 }
 0x20f   : > { %p1160_p0 = scmp.ne.s32.totalorder %s825_s23, %s1159_s25  ;;  %p1167_p4 = scmp.lt.s32.totalorder %s1159_s25, %s1159_s25 }
 0x211   : > { %p1161_p1 = pnand %p1160_p0, %p1400_p13  ;;  %p1168_p5 = por %p1167_p4, %p1166_p3 }
 0x213   : > { %p1162_p2 = pneg %p1161_p1 }
 0x215   : > { %p1169_p6 = pnand %p1168_p5, %p1162_p2 }
 0x217   : > { %1172 = shalt.err (!%p1169_p6)
}
 0x218   : > { %s1217_s26 = smov 128   ;;  %s1218_s0 = smov 8  }
 0x219   : > { %1110 = dma.vmem_to_hbm [thread:$0]  (%p1400_p13), %s825_s23, 1280, %s1431_s7, [#allocation6], %s1217_s26, %s1217_s26, %s1218_s0  }
 0x21a   : > { %1198 = dma.done.wait (%p1400_p13), [#allocation6], 1280  }
 0x21b   : > { %1200 = vsyncadd (%p1400_p13), [#allocation6], 4294966016 }
 0x21c PF: > { %s24_s8 = sadd.s32 1, %s1211_s8   ;;  %s1433_s29 = smov %s1207_s30 }
 0x21d   : > { %p21_p7 = scmp.ge.s32.totalorder %s24_s8, 6   ;;  %s1434_s30 = smov %s1436_s9 }
 0x21f   :  { %23 = sbr.rel (!%p21_p7) target bundleno = 17 (0x11), region = 99 }
 0x224   :  { %840 = vsyncpa [#allocation6], 1 }
 0x225   :  { %842 = vsyncpa [#allocation6 + $0x1], 1 }

</bundles_post_ra>
